<compile_context>
chip_gen: v7x
topology: tpu7x:2x2x1
jax: 0.10.0
libtpu: 0.0.40
codegen_flags: <defaults>
</compile_context>

<pallas_src>
import jax
import jax.numpy as jnp
from jax.experimental import pallas as pl
from jax.experimental.pallas import tpu as pltpu

IN_DIM = 10
HID_DIM = 4
XH_DIM = IN_DIM + HID_DIM            # 14: packed [x | h] contraction dim
GATE_DIM = 4 * HID_DIM               # 16: packed gate lanes [z | r | n_x | n_h]

MAX_BATCH_BLOCK = 2048               # rows per grid step (<< VMEM on all gens)
MIN_SPLIT_BATCH = 256                # below this, splitting only adds overhead


def _batch_block(B):
    """Pick the per-step batch block: full batch when small, else split into
    >=2 blocks (v7x megacore) of at most MAX_BATCH_BLOCK rows, multiple of 8."""
    if B < MIN_SPLIT_BATCH:
        return B
    n_blocks = max(2, pl.cdiv(B, MAX_BATCH_BLOCK))
    bb = pl.cdiv(B, n_blocks)
    return ((bb + 7) // 8) * 8


# --------------------------------------------------------------------------
# Single-step GRU cell (matches the PyTorch module's forward exactly).
# --------------------------------------------------------------------------
def gru_cell_kernel(xh_ref, w_ref, b_ref, out_ref):
    xh = xh_ref[...].astype(jnp.float32)            # (bb, 14) = [x | h]
    h = xh[:, IN_DIM:]                              # (bb, HID) previous hidden

    # One MXU push: all gate pre-activations at once.
    g = jnp.dot(xh, w_ref[...], preferred_element_type=jnp.float32) + b_ref[...]

    zr = jax.nn.sigmoid(g[:, : 2 * HID_DIM])        # z and r share one sigmoid
    z = zr[:, :HID_DIM]
    r = zr[:, HID_DIM:]
    # n = tanh(r * (W_nh h + b_nh) + (W_nx x + b_nx))
    n = jnp.tanh(r * g[:, 3 * HID_DIM:] + g[:, 2 * HID_DIM: 3 * HID_DIM])

    # hidden' = (1 - z) * n + z * hidden
    out_ref[...] = ((1.0 - z) * n + z * h).astype(out_ref.dtype)


@jax.jit
def gru_forward(x, hidden, packed):
    """One GRU cell step: hidden' = GRU(x, hidden)."""
    B = x.shape[0]
    xh = jnp.concatenate([x, hidden], axis=-1)      # (B, 14), single wrapper op
    bb = _batch_block(B)
    grid = (pl.cdiv(B, bb),)

    return pl.pallas_call(
        gru_cell_kernel,
        out_shape=jax.ShapeDtypeStruct((B, HID_DIM), hidden.dtype),
        grid=grid,
        in_specs=[
            pl.BlockSpec((bb, XH_DIM), lambda i: (i, 0)),        # [x|h] blocked
            pl.BlockSpec((XH_DIM, GATE_DIM), lambda i: (0, 0)),  # W: resident
            pl.BlockSpec((1, GATE_DIM), lambda i: (0, 0)),       # bias: resident
        ],
        out_specs=pl.BlockSpec((bb, HID_DIM), lambda i: (i, 0)),
        compiler_params=pltpu.CompilerParams(
            dimension_semantics=("parallel",)),
    )(xh, packed["w"], packed["b"])


# --------------------------------------------------------------------------
# Fused sequence: T GRU steps inside one pallas_call, hidden state in VMEM.
# --------------------------------------------------------------------------
def gru_seq_kernel(xs_ref, h0_ref, wx_ref, wh_ref, b_ref, hT_ref, h_scr):
    t = pl.program_id(1)

    @pl.when(t == 0)
    def _():
        h_scr[...] = h0_ref[...].astype(jnp.float32)

    h = h_scr[...]                                   # (bb, HID) carried in VMEM
    x = xs_ref[0].astype(jnp.float32)                # (bb, IN) this timestep

    g = (jnp.dot(x, wx_ref[...], preferred_element_type=jnp.float32)
         + jnp.dot(h, wh_ref[...], preferred_element_type=jnp.float32)
         + b_ref[...])

    zr = jax.nn.sigmoid(g[:, : 2 * HID_DIM])
    z = zr[:, :HID_DIM]
    r = zr[:, HID_DIM:]
    n = jnp.tanh(r * g[:, 3 * HID_DIM:] + g[:, 2 * HID_DIM: 3 * HID_DIM])

    h_new = (1.0 - z) * n + z * h
    h_scr[...] = h_new

    # Only the final hidden goes back to HBM.
    # TODO(synk): if per-step hiddens are needed, emit them as a lane-dense
    # (bb, T_block*HID) slab rather than (bb, 4) per step (avoids vst.msk).
    @pl.when(t == pl.num_programs(1) - 1)
    def _():
        hT_ref[...] = h_new.astype(hT_ref.dtype)


@jax.jit
def gru_sequence_forward(xs, hidden, packed):
    """Apply the GRU cell over xs[0..T-1]; returns the final hidden state."""
    T, B, _ = xs.shape
    bb = _batch_block(B)
    grid = (pl.cdiv(B, bb), T)                       # T innermost (carry axis)

    return pl.pallas_call(
        gru_seq_kernel,
        out_shape=jax.ShapeDtypeStruct((B, HID_DIM), hidden.dtype),
        grid=grid,
        in_specs=[
            pl.BlockSpec((1, bb, IN_DIM), lambda b, t: (t, b, 0)),   # x stream
            pl.BlockSpec((bb, HID_DIM), lambda b, t: (b, 0)),        # h0
            pl.BlockSpec((IN_DIM, GATE_DIM), lambda b, t: (0, 0)),   # Wx resident
            pl.BlockSpec((HID_DIM, GATE_DIM), lambda b, t: (0, 0)),  # Wh resident
            pl.BlockSpec((1, GATE_DIM), lambda b, t: (0, 0)),        # bias
        ],
        out_specs=pl.BlockSpec((bb, HID_DIM), lambda b, t: (b, 0)),
        scratch_shapes=[pltpu.VMEM((bb, HID_DIM), jnp.float32)],
        compiler_params=pltpu.CompilerParams(
            dimension_semantics=("parallel", "arbitrary")),
    )(xs, hidden, packed["wx"], packed["wh"], packed["b"])


# --------------------------------------------------------------------------
# Parameter construction (PyTorch-style Linear init) + pure-JAX reference.
# --------------------------------------------------------------------------
def init_linear_params(key, in_features, out_features):
    """nn.Linear init: U(-1/sqrt(in), 1/sqrt(in)). Returns (W^T (in,out), b)."""
    kw, kb = jax.random.split(key)
    bound = 1.0 / jnp.sqrt(jnp.float32(in_features))
    w = jax.random.uniform(kw, (out_features, in_features), jnp.float32, -bound, bound)
    b = jax.random.uniform(kb, (out_features,), jnp.float32, -bound, bound)
    return w.T, b


def make_params(key):
    keys = jax.random.split(key, 6)
    wzh, bzh = init_linear_params(keys[0], HID_DIM, HID_DIM)   # linearzh
    wzx, bzx = init_linear_params(keys[1], IN_DIM, HID_DIM)    # linearzx
    wrh, brh = init_linear_params(keys[2], HID_DIM, HID_DIM)   # linearrh
    wrx, brx = init_linear_params(keys[3], IN_DIM, HID_DIM)    # linearrx
    wnx, bnx = init_linear_params(keys[4], IN_DIM, HID_DIM)    # linearnx
    wnh, bnh = init_linear_params(keys[5], HID_DIM, HID_DIM)   # linearnh

    unpacked = dict(wzh=wzh, bzh=bzh, wzx=wzx, bzx=bzx,
                    wrh=wrh, brh=brh, wrx=wrx, brx=brx,
                    wnx=wnx, bnx=bnx, wnh=wnh, bnh=bnh)

    # Block-sparse packing: lanes [z | r | n_x | n_h].
    zx = jnp.zeros((IN_DIM, HID_DIM), jnp.float32)
    zh = jnp.zeros((HID_DIM, HID_DIM), jnp.float32)
    wx_packed = jnp.concatenate([wzx, wrx, wnx, zx], axis=1)     # (10, 16)
    wh_packed = jnp.concatenate([wzh, wrh, zh, wnh], axis=1)     # (4, 16)
    w_packed = jnp.concatenate([wx_packed, wh_packed], axis=0)   # (14, 16)
    b_packed = jnp.concatenate([bzx + bzh, brx + brh, bnx, bnh])[None, :]  # (1, 16)

    packed = dict(w=w_packed, wx=wx_packed, wh=wh_packed, b=b_packed)
    return packed, unpacked


def gru_reference(x, hidden, p):
    """Pure-JAX reference mirroring the PyTorch forward (unfused)."""
    z = jax.nn.sigmoid((hidden @ p["wzh"] + p["bzh"]) + (x @ p["wzx"] + p["bzx"]))
    r = jax.nn.sigmoid((hidden @ p["wrh"] + p["brh"]) + (x @ p["wrx"] + p["brx"]))
    n = jnp.tanh(r * (hidden @ p["wnh"] + p["bnh"]) + (x @ p["wnx"] + p["bnx"]))
    return (1.0 - z) * n + z * hidden


if __name__ == "__main__":
    key = jax.random.PRNGKey(0)
    k_params, k_x, k_h, k_xs = jax.random.split(key, 4)

    batch, seq = 8, 16
    packed, ref_params = make_params(k_params)
    x = jax.random.normal(k_x, (batch, IN_DIM), jnp.float32)
    hidden = jax.random.normal(k_h, (batch, HID_DIM), jnp.float32)

    # --- single step (exactly the module's forward) ---
    out = jax.block_until_ready(gru_forward(x, hidden, packed))
    ref = gru_reference(x, hidden, ref_params)
    assert out.shape == (batch, HID_DIM)
    assert jnp.allclose(out, ref, atol=1e-5, rtol=1e-5), "cell mismatch vs reference"

    # --- fused sequence (time loop inside the kernel, h resident in VMEM) ---
    xs = jax.random.normal(k_xs, (seq, batch, IN_DIM), jnp.float32)
    out_seq = jax.block_until_ready(gru_sequence_forward(xs, hidden, packed))
    ref_h = hidden
    for t in range(seq):
        ref_h = gru_reference(xs[t], ref_h, ref_params)
    assert out_seq.shape == (batch, HID_DIM)
    assert jnp.allclose(out_seq, ref_h, atol=5e-4, rtol=5e-4), "sequence mismatch vs reference"

    print("KERNEL_OK")
</pallas_src>

<mosaic_0001>
module attributes {stable_mosaic.version = 11 : i64} {
  func.func @gru_cell_kernel(%arg0: i32, %arg1: memref<8x14xf32, #tpu.memory_space<vmem>>, %arg2: memref<14x16xf32, #tpu.memory_space<vmem>>, %arg3: memref<1x16xf32, #tpu.memory_space<vmem>>, %arg4: memref<8x4xf32, #tpu.memory_space<vmem>>) attributes {dimension_semantics = [#tpu.dimension_semantics<parallel>], iteration_bounds = array<i64: 1>, scalar_prefetch = 0 : i64, scratch_operands = 0 : i64, tpu.core_type = #tpu.core_type<tc>, window_params = [{transform_indices = @transform_0, window_bounds = array<i64: 8, 14>}, {pipeline_mode = #tpu.pipeline_mode<synchronous>, transform_indices = @transform_1, window_bounds = array<i64: 14, 16>}, {pipeline_mode = #tpu.pipeline_mode<synchronous>, transform_indices = @transform_2, window_bounds = array<i64: 1, 16>}, {transform_indices = @transform_3, window_bounds = array<i64: 8, 4>}]} {
    %c0 = arith.constant 0 : index
    %c0_0 = arith.constant 0 : index
    %0 = vector.load %arg1[%c0, %c0_0] : memref<8x14xf32, #tpu.memory_space<vmem>>, vector<8x14xf32>
    %1 = vector.extract_strided_slice %0 {offsets = [0, 10], sizes = [8, 4], strides = [1, 1]} : vector<8x14xf32> to vector<8x4xf32>
    %c0_1 = arith.constant 0 : index
    %c0_2 = arith.constant 0 : index
    %2 = vector.load %arg2[%c0_1, %c0_2] : memref<14x16xf32, #tpu.memory_space<vmem>>, vector<14x16xf32>
    %cst = arith.constant dense<0.000000e+00> : vector<8x16xf32>
    %3 = tpu.matmul %0, %2, %cst {dimension_numbers = #tpu.dot_dimension_numbers<[1], [0], [0], [1], [0, 0, 1, 1], [], []>} : vector<8x14xf32>, vector<14x16xf32>, vector<8x16xf32> -> vector<8x16xf32>
    %c0_3 = arith.constant 0 : index
    %c0_4 = arith.constant 0 : index
    %4 = vector.load %arg3[%c0_3, %c0_4] : memref<1x16xf32, #tpu.memory_space<vmem>>, vector<1x16xf32>
    %5 = vector.broadcast %4 : vector<1x16xf32> to vector<8x16xf32>
    %6 = arith.addf %3, %5 : vector<8x16xf32>
    %7 = vector.extract_strided_slice %6 {offsets = [0, 0], sizes = [8, 8], strides = [1, 1]} : vector<8x16xf32> to vector<8x8xf32>
    %8 = arith.negf %7 : vector<8x8xf32>
    %9 = math.exp %8 : vector<8x8xf32>
    %cst_5 = arith.constant 1.000000e+00 : f32
    %10 = vector.broadcast %cst_5 : f32 to vector<8x8xf32>
    %11 = arith.addf %10, %9 : vector<8x8xf32>
    %12 = arith.divf %10, %11 : vector<8x8xf32>
    %13 = vector.extract_strided_slice %12 {offsets = [0, 0], sizes = [8, 4], strides = [1, 1]} : vector<8x8xf32> to vector<8x4xf32>
    %14 = vector.extract_strided_slice %12 {offsets = [0, 4], sizes = [8, 4], strides = [1, 1]} : vector<8x8xf32> to vector<8x4xf32>
    %15 = vector.extract_strided_slice %6 {offsets = [0, 12], sizes = [8, 4], strides = [1, 1]} : vector<8x16xf32> to vector<8x4xf32>
    %16 = arith.mulf %14, %15 : vector<8x4xf32>
    %17 = vector.extract_strided_slice %6 {offsets = [0, 8], sizes = [8, 4], strides = [1, 1]} : vector<8x16xf32> to vector<8x4xf32>
    %18 = arith.addf %16, %17 : vector<8x4xf32>
    %19 = math.tanh %18 : vector<8x4xf32>
    %cst_6 = arith.constant 1.000000e+00 : f32
    %20 = vector.broadcast %cst_6 : f32 to vector<8x4xf32>
    %21 = arith.subf %20, %13 : vector<8x4xf32>
    %22 = arith.mulf %21, %19 : vector<8x4xf32>
    %23 = arith.mulf %13, %1 : vector<8x4xf32>
    %24 = arith.addf %22, %23 : vector<8x4xf32>
    %c0_7 = arith.constant 0 : index
    %c0_8 = arith.constant 0 : index
    %25 = vector.load %arg4[%c0_7, %c0_8] : memref<8x4xf32, #tpu.memory_space<vmem>>, vector<8x4xf32>
    tpu.vector_store %arg4[%c0_7, %c0_8], %24 {strides = array<i32>} : memref<8x4xf32, #tpu.memory_space<vmem>>, vector<8x4xf32>,
    return
  }
  func.func @transform_0(%arg0: i32) -> (i32, i32) {
    %c0_i32 = arith.constant 0 : i32
    %c0_i32_0 = arith.constant 0 : i32
    return %arg0, %c0_i32 : i32, i32
  }
  func.func @transform_1(%arg0: i32) -> (i32, i32) {
    %c0_i32 = arith.constant 0 : i32
    %c0_i32_0 = arith.constant 0 : i32
    %c0_i32_1 = arith.constant 0 : i32
    return %c0_i32, %c0_i32_0 : i32, i32
  }
  func.func @transform_2(%arg0: i32) -> (i32, i32) {
    %c0_i32 = arith.constant 0 : i32
    %c0_i32_0 = arith.constant 0 : i32
    %c0_i32_1 = arith.constant 0 : i32
    return %c0_i32, %c0_i32_0 : i32, i32
  }
  func.func @transform_3(%arg0: i32) -> (i32, i32) {
    %c0_i32 = arith.constant 0 : i32
    %c0_i32_0 = arith.constant 0 : i32
    return %arg0, %c0_i32 : i32, i32
  }
}

</mosaic_0001>

<bundles_post_ra>
// kernel: gru_forward.1
= control target key start
LH: loop header
LB: loop body
LE: loop exit
PB: predicated region body
PF: predicated region fallthrough
CT: control target
= control target key end

     0   :  { %vm28_vm0 = vcmask 1045504   ;;  %v166_v0 = vmov 0.0|0.0   ;;  %vm167_vm1 = vmmov 1   ;;  %vm168_vm3 = vmmov 0   ;;  %s171_s20 = smov 124   ;;  %s208_s1 = inlined_call_operand.vmem [shape: f32[14,16], index: 1, kind: input, shape index: {}]   ;;  %s209_s0 = inlined_call_operand.vmem [shape: f32[8,14], index: 0, kind: input, shape index: {}]   ;;  %s210_s2 = inlined_call_operand.vmem [shape: f32[1,16], index: 2, kind: input, shape index: {}]   ;;  %s211_s3 = inlined_call_operand.vmem [shape: f32[8,4], index: 3, kind: output, shape index: {}]  }
   0x1   :  { %149 = vmatprep.subr.bf16.mxu0 %v166_v0  ;;  %v15_v1 = vld [vmem:[%s208_s1] sm:$0xff]  ;;  %v16_v2 = vld [vmem:[%s208_s1 + $0x8] sm:$0x3f]  ;;  %vm151_vm2 = vmpackc.low %vm28_vm0, %vm167_vm1  ;;  %v169_v4 = vmov 0.0   ;;  %vm24_vm4 = vcmask 113664   ;;  %s170_s1 = smov 120  }
   0x2   :  { %v150_v3 = vpack.c.bf16 %v16_v2, %v15_v1  ;;  %146 = vmatprep.mubr.msk.f32.mxu0 %vm168_vm3, %v169_v4  ;;  %v14_v5 = vld [vmem:[%s209_s0] sm:$0xff]  ;;  %s172_s0 = smov 118   ;;  %vm129_vm5 = vcmask 31744  }
   0x3   :  { %v135_v6 = vld [vmem:[%s210_s2] ss:$0 sm:$0xff] }
   0x4   :  { %152 = vmatpush3.bf16.msk.msra.mxu0 %vm151_vm2, %v150_v3 }
   0x7   :  { %147 = vmatmul.mubr.msk.f32.vlgmr.msra.gmra.mrb[0].mxu0 %vm24_vm4, %v14_v5 }
  0xda   :  { %v98_v7 = vpop.f32.mrb[0].mxu0 }
  0xdb   :  { %v99_v8 = vadd.f32 %v135_v6, %v98_v7  ;;  %v148_v9 = vpop.f32.mrb[1].mxu0 }
  0xdd   :  { %109 = vrot.lane.b32.xlu0 %v99_v8, %s170_s1  ;;  %v138_v10 = vmul.f32 -1.442695, %v99_v8 }
  0xdf   :  { %160 = vpow2.f32 %v138_v10 }
  0xe1   :  { %113 = vrot.lane.b32.xlu0 %v99_v8, %s171_s20 }
  0xe9   :  { %v161_v11 = vpop.eup %160 }
  0xea   :  { %v105_v12 = vadd.f32 1.0, %v161_v11 }
  0xec   :  { %162 = vrcp.f32 %v105_v12 }
  0xf6   :  { %v163_v14 = vpop.eup %162 }
  0xf7   :  { %v118_v20 = vsub.f32 1.0, %v163_v14 }
 0x14f   :  { %v110_v13 = vpop.permute.xlu0 %109 }
 0x150   :  { %v112_v15 = vmul.f32 %v163_v14, %v110_v13 }
 0x153   :  { %v114_v16 = vpop.permute.xlu0 %113 }
 0x154   :  { %v116_v17 = vadd.f32 %v114_v16, %v112_v15 }
 0x156   :  { %164 = vtanh.f32 %v116_v17 }
 0x160   :  { %v165_v18 = vpop.eup %164 }
 0x161   :  { %120 = vrot.lane.b32.xlu1 %v165_v18, %s171_s20 }
 0x165   :  { %124 = vrot.lane.b32.xlu1 %v14_v5, %s172_s0 }
 0x1d3   :  { %v121_v19 = vpop.permute.xlu1 %120 }
 0x1d4   :  { %v123_v22 = vmul.f32 %v121_v19, %v118_v20 }
 0x1d7   :  { %v125_v21 = vpop.permute.xlu1 %124 }
 0x1d8   :  { %v127_v23 = vmul.f32 %v163_v14, %v125_v21 }
 0x1da   :  { %v128_v24 = vadd.f32 %v127_v23, %v123_v22 }
 0x1dc   :  { %130 = vst.msk [vmem:[%s211_s3] sm:$0xff] %vm129_vm5, %v128_v24 }

</bundles_post_ra>
